<compile_context>
chip_gen: v5e
topology: v5e:2x2
jax: 0.10.0
libtpu: 0.0.40
codegen_flags: <defaults>
</compile_context>

<pallas_src>
import jax
import jax.numpy as jnp
from jax.experimental import pallas as pl
from jax.experimental.pallas import tpu as pltpu


def bpr_mf_kernel(u_ref, i_ref, j_ref, ug_ref, vg_ref, uv_ref, vv_ref, o_ref,
                  vu_s, vi_s, vj_s, gu_s, gi_s, gj_s):
    """Fused gather + weight-norm + batched dot + reduce.

    u_ref/i_ref/j_ref: SMEM (B,) int32 indices
    ug_ref:            VMEM (n_user, 1) f32 weight-norm g for users
    vg_ref:            VMEM (n_item, 1) f32 weight-norm g for items
    uv_ref:            VMEM (n_user, D) f32 weight-norm v for users
    vv_ref:            VMEM (n_item, D) f32 weight-norm v for items
    o_ref:             VMEM (1, 128) f32 — lane 0 = pred_i, lane 1 = pred_j
    vu_s/vi_s/vj_s:    VMEM (B, D) f32 scratch — gathered rows
    gu_s/gi_s/gj_s:    VMEM (B, 1) f32 scratch — gathered g factors
    """
    B = u_ref.shape[0]

    # ---- Gather phase: assemble (B, D) row tiles and (B, 1) g columns. -----
    # B is small & static -> fully unrolled; each step is dynamic-sublane
    # loads + static-sublane stores (ld/st slots only, no XLU/EUP work).
    for b in range(B):
        ui = u_ref[b]
        ii = i_ref[b]
        ji = j_ref[b]
        vu_s[pl.ds(b, 1), :] = uv_ref[pl.ds(ui, 1), :]
        vi_s[pl.ds(b, 1), :] = vv_ref[pl.ds(ii, 1), :]
        vj_s[pl.ds(b, 1), :] = vv_ref[pl.ds(ji, 1), :]
        gu_s[pl.ds(b, 1), :] = ug_ref[pl.ds(ui, 1), :]
        gi_s[pl.ds(b, 1), :] = vg_ref[pl.ds(ii, 1), :]
        gj_s[pl.ds(b, 1), :] = vg_ref[pl.ds(ji, 1), :]

    vu = vu_s[...]          # (B, D)
    vi = vi_s[...]
    vj = vj_s[...]
    gu = gu_s[...]          # (B, 1)
    gi = gi_s[...]
    gj = gj_s[...]

    # ---- Batched math: 5 lane reductions on (B, D), 2 rsqrt on (B, 1). -----
    # NOTE: for large B these 5 reductions can be offloaded to the (idle) MXU
    # by stacking the product tiles along sublanes and matmul'ing ones((D, 1)).
    nu = jnp.sum(vu * vu, axis=-1, keepdims=True)   # (B, 1) = ||v_u||^2
    ni = jnp.sum(vi * vi, axis=-1, keepdims=True)
    nj = jnp.sum(vj * vj, axis=-1, keepdims=True)
    di = jnp.sum(vu * vi, axis=-1, keepdims=True)   # <v_u, v_i>
    dj = jnp.sum(vu * vj, axis=-1, keepdims=True)   # <v_u, v_j>

    # Weight-norm folded into (B, 1) scalar-column math; exact rsqrt (EUP).
    ti = (gu * gi) * jax.lax.rsqrt(nu * ni) * di    # per-sample terms of pred_i
    tj = (gu * gj) * jax.lax.rsqrt(nu * nj) * dj    # per-sample terms of pred_j

    # ---- Pack i-terms into lane 0, j-terms into lane 1, one sublane reduce,
    #      single unmasked lane-dense (1, 128) store. ------------------------
    lane = jax.lax.broadcasted_iota(jnp.int32, (B, o_ref.shape[-1]), 1)
    packed = jnp.where(lane == 0, ti, jnp.where(lane == 1, tj, jnp.float32(0.0)))
    o_ref[...] = jnp.sum(packed, axis=0, keepdims=True)


def bpr_mf_forward(u, i, j, params):
    """Single fused Pallas call: tables + g columns in VMEM, indices in SMEM."""
    u_v = params["u_v"]                    # (n_user, D) f32
    v_v = params["v_v"]                    # (n_item, D) f32
    u_g = params["u_g"]                    # (n_user, 1) f32
    v_g = params["v_g"]                    # (n_item, 1) f32
    B = u.shape[0]
    D = u_v.shape[1]

    smem = pl.BlockSpec(memory_space=pltpu.MemorySpace.SMEM)
    vmem = pl.BlockSpec(memory_space=pltpu.MemorySpace.VMEM)

    out = pl.pallas_call(
        bpr_mf_kernel,
        out_shape=jax.ShapeDtypeStruct((1, 128), jnp.float32),
        in_specs=[smem, smem, smem,       # u, i, j indices
                  vmem, vmem,             # u_g, v_g (n, 1) columns
                  vmem, vmem],            # u_v, v_v tables
        out_specs=vmem,
        scratch_shapes=[
            pltpu.VMEM((B, D), jnp.float32),   # gathered user rows
            pltpu.VMEM((B, D), jnp.float32),   # gathered item-i rows
            pltpu.VMEM((B, D), jnp.float32),   # gathered item-j rows
            pltpu.VMEM((B, 1), jnp.float32),   # gathered g_u
            pltpu.VMEM((B, 1), jnp.float32),   # gathered g_i
            pltpu.VMEM((B, 1), jnp.float32),   # gathered g_j
        ],
    )(u.astype(jnp.int32), i.astype(jnp.int32), j.astype(jnp.int32),
      u_g, v_g, u_v, v_v)

    return out[0, 0], out[0, 1]


def init_params(key, n_user, n_item, embed_dim):
    """Deterministic init matching the module: v ~ N(0, 0.01); weight_norm g is
    initialized to the per-row norm of v (so the effective initial weight
    equals v, exactly as PyTorch weight_norm does)."""
    ku, kv = jax.random.split(key)
    u_v = 0.01 * jax.random.normal(ku, (n_user, embed_dim), dtype=jnp.float32)
    v_v = 0.01 * jax.random.normal(kv, (n_item, embed_dim), dtype=jnp.float32)
    u_g = jnp.sqrt(jnp.sum(u_v * u_v, axis=-1, keepdims=True))  # (n_user, 1)
    v_g = jnp.sqrt(jnp.sum(v_v * v_v, axis=-1, keepdims=True))  # (n_item, 1)
    return {"u_v": u_v, "u_g": u_g, "v_v": v_v, "v_g": v_g}


def reference_forward(u, i, j, params):
    """Pure-JAX reference mirroring the PyTorch module exactly."""
    def wn(g, v):
        return g * v / jnp.sqrt(jnp.sum(v * v, axis=-1, keepdims=True))
    w_u = wn(params["u_g"][u], params["u_v"][u])
    h_i = wn(params["v_g"][i], params["v_v"][i])
    h_j = wn(params["v_g"][j], params["v_v"][j])
    return jnp.sum(w_u * h_i), jnp.sum(w_u * h_j)


if __name__ == "__main__":
    n_user, n_item, embed_dim, batch = 64, 128, 128, 8

    key = jax.random.PRNGKey(0)
    k_param, k_u, k_i, k_j = jax.random.split(key, 4)
    params = init_params(k_param, n_user, n_item, embed_dim)

    u = jax.random.randint(k_u, (batch,), 0, n_user, dtype=jnp.int32)
    i = jax.random.randint(k_i, (batch,), 0, n_item, dtype=jnp.int32)
    j = jax.random.randint(k_j, (batch,), 0, n_item, dtype=jnp.int32)

    pred_i, pred_j = bpr_mf_forward(u, i, j, params)
    jax.block_until_ready((pred_i, pred_j))

    ref_i, ref_j = reference_forward(u, i, j, params)
    assert jnp.allclose(pred_i, ref_i, rtol=1e-5, atol=1e-6), (pred_i, ref_i)
    assert jnp.allclose(pred_j, ref_j, rtol=1e-5, atol=1e-6), (pred_j, ref_j)

    print("KERNEL_OK")
</pallas_src>

<mosaic_0001>
module attributes {stable_mosaic.version = 11 : i64} {
  func.func @bpr_mf_kernel(%arg0: memref<8xi32, #tpu.memory_space<smem>>, %arg1: memref<8xi32, #tpu.memory_space<smem>>, %arg2: memref<8xi32, #tpu.memory_space<smem>>, %arg3: memref<64x1xf32, #tpu.memory_space<vmem>>, %arg4: memref<128x1xf32, #tpu.memory_space<vmem>>, %arg5: memref<64x128xf32, #tpu.memory_space<vmem>>, %arg6: memref<128x128xf32, #tpu.memory_space<vmem>>, %arg7: memref<1x128xf32, #tpu.memory_space<vmem>>, %arg8: memref<8x128xf32, #tpu.memory_space<vmem>>, %arg9: memref<8x128xf32, #tpu.memory_space<vmem>>, %arg10: memref<8x128xf32, #tpu.memory_space<vmem>>, %arg11: memref<8x1xf32, #tpu.memory_space<vmem>>, %arg12: memref<8x1xf32, #tpu.memory_space<vmem>>, %arg13: memref<8x1xf32, #tpu.memory_space<vmem>>) attributes {dimension_semantics = [], scalar_prefetch = 0 : i64, scratch_operands = 6 : i64, tpu.core_type = #tpu.core_type<tc>} {
    %c0 = arith.constant 0 : index
    %0 = memref.load %arg0[%c0] : memref<8xi32, #tpu.memory_space<smem>>
    %c0_0 = arith.constant 0 : index
    %1 = memref.load %arg1[%c0_0] : memref<8xi32, #tpu.memory_space<smem>>
    %c0_1 = arith.constant 0 : index
    %2 = memref.load %arg2[%c0_1] : memref<8xi32, #tpu.memory_space<smem>>
    %3 = arith.index_cast %0 : i32 to index
    %c0_2 = arith.constant 0 : index
    %4 = vector.load %arg5[%3, %c0_2] : memref<64x128xf32, #tpu.memory_space<vmem>>, vector<1x128xf32>
    %c0_3 = arith.constant 0 : index
    %c0_4 = arith.constant 0 : index
    %5 = vector.load %arg8[%c0_3, %c0_4] : memref<8x128xf32, #tpu.memory_space<vmem>>, vector<1x128xf32>
    tpu.vector_store %arg8[%c0_3, %c0_4], %4 {strides = array<i32>} : memref<8x128xf32, #tpu.memory_space<vmem>>, vector<1x128xf32>,
    %6 = arith.index_cast %1 : i32 to index
    %c0_5 = arith.constant 0 : index
    %7 = vector.load %arg6[%6, %c0_5] : memref<128x128xf32, #tpu.memory_space<vmem>>, vector<1x128xf32>
    %c0_6 = arith.constant 0 : index
    %c0_7 = arith.constant 0 : index
    %8 = vector.load %arg9[%c0_6, %c0_7] : memref<8x128xf32, #tpu.memory_space<vmem>>, vector<1x128xf32>
    tpu.vector_store %arg9[%c0_6, %c0_7], %7 {strides = array<i32>} : memref<8x128xf32, #tpu.memory_space<vmem>>, vector<1x128xf32>,
    %9 = arith.index_cast %2 : i32 to index
    %c0_8 = arith.constant 0 : index
    %10 = vector.load %arg6[%9, %c0_8] : memref<128x128xf32, #tpu.memory_space<vmem>>, vector<1x128xf32>
    %c0_9 = arith.constant 0 : index
    %c0_10 = arith.constant 0 : index
    %11 = vector.load %arg10[%c0_9, %c0_10] : memref<8x128xf32, #tpu.memory_space<vmem>>, vector<1x128xf32>
    tpu.vector_store %arg10[%c0_9, %c0_10], %10 {strides = array<i32>} : memref<8x128xf32, #tpu.memory_space<vmem>>, vector<1x128xf32>,
    %12 = arith.index_cast %0 : i32 to index
    %c0_11 = arith.constant 0 : index
    %13 = vector.load %arg3[%12, %c0_11] : memref<64x1xf32, #tpu.memory_space<vmem>>, vector<1x1xf32>
    %c0_12 = arith.constant 0 : index
    %c0_13 = arith.constant 0 : index
    %14 = vector.load %arg11[%c0_12, %c0_13] : memref<8x1xf32, #tpu.memory_space<vmem>>, vector<1x1xf32>
    tpu.vector_store %arg11[%c0_12, %c0_13], %13 {strides = array<i32>} : memref<8x1xf32, #tpu.memory_space<vmem>>, vector<1x1xf32>,
    %15 = arith.index_cast %1 : i32 to index
    %c0_14 = arith.constant 0 : index
    %16 = vector.load %arg4[%15, %c0_14] : memref<128x1xf32, #tpu.memory_space<vmem>>, vector<1x1xf32>
    %c0_15 = arith.constant 0 : index
    %c0_16 = arith.constant 0 : index
    %17 = vector.load %arg12[%c0_15, %c0_16] : memref<8x1xf32, #tpu.memory_space<vmem>>, vector<1x1xf32>
    tpu.vector_store %arg12[%c0_15, %c0_16], %16 {strides = array<i32>} : memref<8x1xf32, #tpu.memory_space<vmem>>, vector<1x1xf32>,
    %18 = arith.index_cast %2 : i32 to index
    %c0_17 = arith.constant 0 : index
    %19 = vector.load %arg4[%18, %c0_17] : memref<128x1xf32, #tpu.memory_space<vmem>>, vector<1x1xf32>
    %c0_18 = arith.constant 0 : index
    %c0_19 = arith.constant 0 : index
    %20 = vector.load %arg13[%c0_18, %c0_19] : memref<8x1xf32, #tpu.memory_space<vmem>>, vector<1x1xf32>
    tpu.vector_store %arg13[%c0_18, %c0_19], %19 {strides = array<i32>} : memref<8x1xf32, #tpu.memory_space<vmem>>, vector<1x1xf32>,
    %c1 = arith.constant 1 : index
    %21 = memref.load %arg0[%c1] : memref<8xi32, #tpu.memory_space<smem>>
    %c1_20 = arith.constant 1 : index
    %22 = memref.load %arg1[%c1_20] : memref<8xi32, #tpu.memory_space<smem>>
    %c1_21 = arith.constant 1 : index
    %23 = memref.load %arg2[%c1_21] : memref<8xi32, #tpu.memory_space<smem>>
    %24 = arith.index_cast %21 : i32 to index
    %c0_22 = arith.constant 0 : index
    %25 = vector.load %arg5[%24, %c0_22] : memref<64x128xf32, #tpu.memory_space<vmem>>, vector<1x128xf32>
    %c1_23 = arith.constant 1 : index
    %c0_24 = arith.constant 0 : index
    %26 = vector.load %arg8[%c1_23, %c0_24] : memref<8x128xf32, #tpu.memory_space<vmem>>, vector<1x128xf32>
    tpu.vector_store %arg8[%c1_23, %c0_24], %25 {strides = array<i32>} : memref<8x128xf32, #tpu.memory_space<vmem>>, vector<1x128xf32>,
    %27 = arith.index_cast %22 : i32 to index
    %c0_25 = arith.constant 0 : index
    %28 = vector.load %arg6[%27, %c0_25] : memref<128x128xf32, #tpu.memory_space<vmem>>, vector<1x128xf32>
    %c1_26 = arith.constant 1 : index
    %c0_27 = arith.constant 0 : index
    %29 = vector.load %arg9[%c1_26, %c0_27] : memref<8x128xf32, #tpu.memory_space<vmem>>, vector<1x128xf32>
    tpu.vector_store %arg9[%c1_26, %c0_27], %28 {strides = array<i32>} : memref<8x128xf32, #tpu.memory_space<vmem>>, vector<1x128xf32>,
    %30 = arith.index_cast %23 : i32 to index
    %c0_28 = arith.constant 0 : index
    %31 = vector.load %arg6[%30, %c0_28] : memref<128x128xf32, #tpu.memory_space<vmem>>, vector<1x128xf32>
    %c1_29 = arith.constant 1 : index
    %c0_30 = arith.constant 0 : index
    %32 = vector.load %arg10[%c1_29, %c0_30] : memref<8x128xf32, #tpu.memory_space<vmem>>, vector<1x128xf32>
    tpu.vector_store %arg10[%c1_29, %c0_30], %31 {strides = array<i32>} : memref<8x128xf32, #tpu.memory_space<vmem>>, vector<1x128xf32>,
    %33 = arith.index_cast %21 : i32 to index
    %c0_31 = arith.constant 0 : index
    %34 = vector.load %arg3[%33, %c0_31] : memref<64x1xf32, #tpu.memory_space<vmem>>, vector<1x1xf32>
    %c1_32 = arith.constant 1 : index
    %c0_33 = arith.constant 0 : index
    %35 = vector.load %arg11[%c1_32, %c0_33] : memref<8x1xf32, #tpu.memory_space<vmem>>, vector<1x1xf32>
    tpu.vector_store %arg11[%c1_32, %c0_33], %34 {strides = array<i32>} : memref<8x1xf32, #tpu.memory_space<vmem>>, vector<1x1xf32>,
    %36 = arith.index_cast %22 : i32 to index
    %c0_34 = arith.constant 0 : index
    %37 = vector.load %arg4[%36, %c0_34] : memref<128x1xf32, #tpu.memory_space<vmem>>, vector<1x1xf32>
    %c1_35 = arith.constant 1 : index
    %c0_36 = arith.constant 0 : index
    %38 = vector.load %arg12[%c1_35, %c0_36] : memref<8x1xf32, #tpu.memory_space<vmem>>, vector<1x1xf32>
    tpu.vector_store %arg12[%c1_35, %c0_36], %37 {strides = array<i32>} : memref<8x1xf32, #tpu.memory_space<vmem>>, vector<1x1xf32>,
    %39 = arith.index_cast %23 : i32 to index
    %c0_37 = arith.constant 0 : index
    %40 = vector.load %arg4[%39, %c0_37] : memref<128x1xf32, #tpu.memory_space<vmem>>, vector<1x1xf32>
    %c1_38 = arith.constant 1 : index
    %c0_39 = arith.constant 0 : index
    %41 = vector.load %arg13[%c1_38, %c0_39] : memref<8x1xf32, #tpu.memory_space<vmem>>, vector<1x1xf32>
    tpu.vector_store %arg13[%c1_38, %c0_39], %40 {strides = array<i32>} : memref<8x1xf32, #tpu.memory_space<vmem>>, vector<1x1xf32>,
    %c2 = arith.constant 2 : index
    %42 = memref.load %arg0[%c2] : memref<8xi32, #tpu.memory_space<smem>>
    %c2_40 = arith.constant 2 : index
    %43 = memref.load %arg1[%c2_40] : memref<8xi32, #tpu.memory_space<smem>>
    %c2_41 = arith.constant 2 : index
    %44 = memref.load %arg2[%c2_41] : memref<8xi32, #tpu.memory_space<smem>>
    %45 = arith.index_cast %42 : i32 to index
    %c0_42 = arith.constant 0 : index
    %46 = vector.load %arg5[%45, %c0_42] : memref<64x128xf32, #tpu.memory_space<vmem>>, vector<1x128xf32>
    %c2_43 = arith.constant 2 : index
    %c0_44 = arith.constant 0 : index
    %47 = vector.load %arg8[%c2_43, %c0_44] : memref<8x128xf32, #tpu.memory_space<vmem>>, vector<1x128xf32>
    tpu.vector_store %arg8[%c2_43, %c0_44], %46 {strides = array<i32>} : memref<8x128xf32, #tpu.memory_space<vmem>>, vector<1x128xf32>,
    %48 = arith.index_cast %43 : i32 to index
    %c0_45 = arith.constant 0 : index
    %49 = vector.load %arg6[%48, %c0_45] : memref<128x128xf32, #tpu.memory_space<vmem>>, vector<1x128xf32>
    %c2_46 = arith.constant 2 : index
    %c0_47 = arith.constant 0 : index
    %50 = vector.load %arg9[%c2_46, %c0_47] : memref<8x128xf32, #tpu.memory_space<vmem>>, vector<1x128xf32>
    tpu.vector_store %arg9[%c2_46, %c0_47], %49 {strides = array<i32>} : memref<8x128xf32, #tpu.memory_space<vmem>>, vector<1x128xf32>,
    %51 = arith.index_cast %44 : i32 to index
    %c0_48 = arith.constant 0 : index
    %52 = vector.load %arg6[%51, %c0_48] : memref<128x128xf32, #tpu.memory_space<vmem>>, vector<1x128xf32>
    %c2_49 = arith.constant 2 : index
    %c0_50 = arith.constant 0 : index
    %53 = vector.load %arg10[%c2_49, %c0_50] : memref<8x128xf32, #tpu.memory_space<vmem>>, vector<1x128xf32>
    tpu.vector_store %arg10[%c2_49, %c0_50], %52 {strides = array<i32>} : memref<8x128xf32, #tpu.memory_space<vmem>>, vector<1x128xf32>,
    %54 = arith.index_cast %42 : i32 to index
    %c0_51 = arith.constant 0 : index
    %55 = vector.load %arg3[%54, %c0_51] : memref<64x1xf32, #tpu.memory_space<vmem>>, vector<1x1xf32>
    %c2_52 = arith.constant 2 : index
    %c0_53 = arith.constant 0 : index
    %56 = vector.load %arg11[%c2_52, %c0_53] : memref<8x1xf32, #tpu.memory_space<vmem>>, vector<1x1xf32>
    tpu.vector_store %arg11[%c2_52, %c0_53], %55 {strides = array<i32>} : memref<8x1xf32, #tpu.memory_space<vmem>>, vector<1x1xf32>,
    %57 = arith.index_cast %43 : i32 to index
    %c0_54 = arith.constant 0 : index
    %58 = vector.load %arg4[%57, %c0_54] : memref<128x1xf32, #tpu.memory_space<vmem>>, vector<1x1xf32>
    %c2_55 = arith.constant 2 : index
    %c0_56 = arith.constant 0 : index
    %59 = vector.load %arg12[%c2_55, %c0_56] : memref<8x1xf32, #tpu.memory_space<vmem>>, vector<1x1xf32>
    tpu.vector_store %arg12[%c2_55, %c0_56], %58 {strides = array<i32>} : memref<8x1xf32, #tpu.memory_space<vmem>>, vector<1x1xf32>,
    %60 = arith.index_cast %44 : i32 to index
    %c0_57 = arith.constant 0 : index
    %61 = vector.load %arg4[%60, %c0_57] : memref<128x1xf32, #tpu.memory_space<vmem>>, vector<1x1xf32>
    %c2_58 = arith.constant 2 : index
    %c0_59 = arith.constant 0 : index
    %62 = vector.load %arg13[%c2_58, %c0_59] : memref<8x1xf32, #tpu.memory_space<vmem>>, vector<1x1xf32>
    tpu.vector_store %arg13[%c2_58, %c0_59], %61 {strides = array<i32>} : memref<8x1xf32, #tpu.memory_space<vmem>>, vector<1x1xf32>,
    %c3 = arith.constant 3 : index
    %63 = memref.load %arg0[%c3] : memref<8xi32, #tpu.memory_space<smem>>
    %c3_60 = arith.constant 3 : index
    %64 = memref.load %arg1[%c3_60] : memref<8xi32, #tpu.memory_space<smem>>
    %c3_61 = arith.constant 3 : index
    %65 = memref.load %arg2[%c3_61] : memref<8xi32, #tpu.memory_space<smem>>
    %66 = arith.index_cast %63 : i32 to index
    %c0_62 = arith.constant 0 : index
    %67 = vector.load %arg5[%66, %c0_62] : memref<64x128xf32, #tpu.memory_space<vmem>>, vector<1x128xf32>
    %c3_63 = arith.constant 3 : index
    %c0_64 = arith.constant 0 : index
    %68 = vector.load %arg8[%c3_63, %c0_64] : memref<8x128xf32, #tpu.memory_space<vmem>>, vector<1x128xf32>
    tpu.vector_store %arg8[%c3_63, %c0_64], %67 {strides = array<i32>} : memref<8x128xf32, #tpu.memory_space<vmem>>, vector<1x128xf32>,
    %69 = arith.index_cast %64 : i32 to index
    %c0_65 = arith.constant 0 : index
    %70 = vector.load %arg6[%69, %c0_65] : memref<128x128xf32, #tpu.memory_space<vmem>>, vector<1x128xf32>
    %c3_66 = arith.constant 3 : index
    %c0_67 = arith.constant 0 : index
    %71 = vector.load %arg9[%c3_66, %c0_67] : memref<8x128xf32, #tpu.memory_space<vmem>>, vector<1x128xf32>
    tpu.vector_store %arg9[%c3_66, %c0_67], %70 {strides = array<i32>} : memref<8x128xf32, #tpu.memory_space<vmem>>, vector<1x128xf32>,
    %72 = arith.index_cast %65 : i32 to index
    %c0_68 = arith.constant 0 : index
    %73 = vector.load %arg6[%72, %c0_68] : memref<128x128xf32, #tpu.memory_space<vmem>>, vector<1x128xf32>
    %c3_69 = arith.constant 3 : index
    %c0_70 = arith.constant 0 : index
    %74 = vector.load %arg10[%c3_69, %c0_70] : memref<8x128xf32, #tpu.memory_space<vmem>>, vector<1x128xf32>
    tpu.vector_store %arg10[%c3_69, %c0_70], %73 {strides = array<i32>} : memref<8x128xf32, #tpu.memory_space<vmem>>, vector<1x128xf32>,
    %75 = arith.index_cast %63 : i32 to index
    %c0_71 = arith.constant 0 : index
    %76 = vector.load %arg3[%75, %c0_71] : memref<64x1xf32, #tpu.memory_space<vmem>>, vector<1x1xf32>
    %c3_72 = arith.constant 3 : index
    %c0_73 = arith.constant 0 : index
    %77 = vector.load %arg11[%c3_72, %c0_73] : memref<8x1xf32, #tpu.memory_space<vmem>>, vector<1x1xf32>
    tpu.vector_store %arg11[%c3_72, %c0_73], %76 {strides = array<i32>} : memref<8x1xf32, #tpu.memory_space<vmem>>, vector<1x1xf32>,
    %78 = arith.index_cast %64 : i32 to index
    %c0_74 = arith.constant 0 : index
    %79 = vector.load %arg4[%78, %c0_74] : memref<128x1xf32, #tpu.memory_space<vmem>>, vector<1x1xf32>
    %c3_75 = arith.constant 3 : index
    %c0_76 = arith.constant 0 : index
    %80 = vector.load %arg12[%c3_75, %c0_76] : memref<8x1xf32, #tpu.memory_space<vmem>>, vector<1x1xf32>
    tpu.vector_store %arg12[%c3_75, %c0_76], %79 {strides = array<i32>} : memref<8x1xf32, #tpu.memory_space<vmem>>, vector<1x1xf32>,
    %81 = arith.index_cast %65 : i32 to index
    %c0_77 = arith.constant 0 : index
    %82 = vector.load %arg4[%81, %c0_77] : memref<128x1xf32, #tpu.memory_space<vmem>>, vector<1x1xf32>
    %c3_78 = arith.constant 3 : index
    %c0_79 = arith.constant 0 : index
    %83 = vector.load %arg13[%c3_78, %c0_79] : memref<8x1xf32, #tpu.memory_space<vmem>>, vector<1x1xf32>
    tpu.vector_store %arg13[%c3_78, %c0_79], %82 {strides = array<i32>} : memref<8x1xf32, #tpu.memory_space<vmem>>, vector<1x1xf32>,
    %c4 = arith.constant 4 : index
    %84 = memref.load %arg0[%c4] : memref<8xi32, #tpu.memory_space<smem>>
    %c4_80 = arith.constant 4 : index
    %85 = memref.load %arg1[%c4_80] : memref<8xi32, #tpu.memory_space<smem>>
    %c4_81 = arith.constant 4 : index
    %86 = memref.load %arg2[%c4_81] : memref<8xi32, #tpu.memory_space<smem>>
    %87 = arith.index_cast %84 : i32 to index
    %c0_82 = arith.constant 0 : index
    %88 = vector.load %arg5[%87, %c0_82] : memref<64x128xf32, #tpu.memory_space<vmem>>, vector<1x128xf32>
    %c4_83 = arith.constant 4 : index
    %c0_84 = arith.constant 0 : index
    %89 = vector.load %arg8[%c4_83, %c0_84] : memref<8x128xf32, #tpu.memory_space<vmem>>, vector<1x128xf32>
    tpu.vector_store %arg8[%c4_83, %c0_84], %88 {strides = array<i32>} : memref<8x128xf32, #tpu.memory_space<vmem>>, vector<1x128xf32>,
    %90 = arith.index_cast %85 : i32 to index
    %c0_85 = arith.constant 0 : index
    %91 = vector.load %arg6[%90, %c0_85] : memref<128x128xf32, #tpu.memory_space<vmem>>, vector<1x128xf32>
    %c4_86 = arith.constant 4 : index
    %c0_87 = arith.constant 0 : index
    %92 = vector.load %arg9[%c4_86, %c0_87] : memref<8x128xf32, #tpu.memory_space<vmem>>, vector<1x128xf32>
    tpu.vector_store %arg9[%c4_86, %c0_87], %91 {strides = array<i32>} : memref<8x128xf32, #tpu.memory_space<vmem>>, vector<1x128xf32>,
    %93 = arith.index_cast %86 : i32 to index
    %c0_88 = arith.constant 0 : index
    %94 = vector.load %arg6[%93, %c0_88] : memref<128x128xf32, #tpu.memory_space<vmem>>, vector<1x128xf32>
    %c4_89 = arith.constant 4 : index
    %c0_90 = arith.constant 0 : index
    %95 = vector.load %arg10[%c4_89, %c0_90] : memref<8x128xf32, #tpu.memory_space<vmem>>, vector<1x128xf32>
    tpu.vector_store %arg10[%c4_89, %c0_90], %94 {strides = array<i32>} : memref<8x128xf32, #tpu.memory_space<vmem>>, vector<1x128xf32>,
    %96 = arith.index_cast %84 : i32 to index
    %c0_91 = arith.constant 0 : index
    %97 = vector.load %arg3[%96, %c0_91] : memref<64x1xf32, #tpu.memory_space<vmem>>, vector<1x1xf32>
    %c4_92 = arith.constant 4 : index
    %c0_93 = arith.constant 0 : index
    %98 = vector.load %arg11[%c4_92, %c0_93] : memref<8x1xf32, #tpu.memory_space<vmem>>, vector<1x1xf32>
    tpu.vector_store %arg11[%c4_92, %c0_93], %97 {strides = array<i32>} : memref<8x1xf32, #tpu.memory_space<vmem>>, vector<1x1xf32>,
    %99 = arith.index_cast %85 : i32 to index
    %c0_94 = arith.constant 0 : index
    %100 = vector.load %arg4[%99, %c0_94] : memref<128x1xf32, #tpu.memory_space<vmem>>, vector<1x1xf32>
    %c4_95 = arith.constant 4 : index
    %c0_96 = arith.constant 0 : index
    %101 = vector.load %arg12[%c4_95, %c0_96] : memref<8x1xf32, #tpu.memory_space<vmem>>, vector<1x1xf32>
    tpu.vector_store %arg12[%c4_95, %c0_96], %100 {strides = array<i32>} : memref<8x1xf32, #tpu.memory_space<vmem>>, vector<1x1xf32>,
    %102 = arith.index_cast %86 : i32 to index
    %c0_97 = arith.constant 0 : index
    %103 = vector.load %arg4[%102, %c0_97] : memref<128x1xf32, #tpu.memory_space<vmem>>, vector<1x1xf32>
    %c4_98 = arith.constant 4 : index
    %c0_99 = arith.constant 0 : index
    %104 = vector.load %arg13[%c4_98, %c0_99] : memref<8x1xf32, #tpu.memory_space<vmem>>, vector<1x1xf32>
    tpu.vector_store %arg13[%c4_98, %c0_99], %103 {strides = array<i32>} : memref<8x1xf32, #tpu.memory_space<vmem>>, vector<1x1xf32>,
    %c5 = arith.constant 5 : index
    %105 = memref.load %arg0[%c5] : memref<8xi32, #tpu.memory_space<smem>>
    %c5_100 = arith.constant 5 : index
    %106 = memref.load %arg1[%c5_100] : memref<8xi32, #tpu.memory_space<smem>>
    %c5_101 = arith.constant 5 : index
    %107 = memref.load %arg2[%c5_101] : memref<8xi32, #tpu.memory_space<smem>>
    %108 = arith.index_cast %105 : i32 to index
    %c0_102 = arith.constant 0 : index
    %109 = vector.load %arg5[%108, %c0_102] : memref<64x128xf32, #tpu.memory_space<vmem>>, vector<1x128xf32>
    %c5_103 = arith.constant 5 : index
    %c0_104 = arith.constant 0 : index
    %110 = vector.load %arg8[%c5_103, %c0_104] : memref<8x128xf32, #tpu.memory_space<vmem>>, vector<1x128xf32>
    tpu.vector_store %arg8[%c5_103, %c0_104], %109 {strides = array<i32>} : memref<8x128xf32, #tpu.memory_space<vmem>>, vector<1x128xf32>,
    %111 = arith.index_cast %106 : i32 to index
    %c0_105 = arith.constant 0 : index
    %112 = vector.load %arg6[%111, %c0_105] : memref<128x128xf32, #tpu.memory_space<vmem>>, vector<1x128xf32>
    %c5_106 = arith.constant 5 : index
    %c0_107 = arith.constant 0 : index
    %113 = vector.load %arg9[%c5_106, %c0_107] : memref<8x128xf32, #tpu.memory_space<vmem>>, vector<1x128xf32>
    tpu.vector_store %arg9[%c5_106, %c0_107], %112 {strides = array<i32>} : memref<8x128xf32, #tpu.memory_space<vmem>>, vector<1x128xf32>,
    %114 = arith.index_cast %107 : i32 to index
    %c0_108 = arith.constant 0 : index
    %115 = vector.load %arg6[%114, %c0_108] : memref<128x128xf32, #tpu.memory_space<vmem>>, vector<1x128xf32>
    %c5_109 = arith.constant 5 : index
    %c0_110 = arith.constant 0 : index
    %116 = vector.load %arg10[%c5_109, %c0_110] : memref<8x128xf32, #tpu.memory_space<vmem>>, vector<1x128xf32>
    tpu.vector_store %arg10[%c5_109, %c0_110], %115 {strides = array<i32>} : memref<8x128xf32, #tpu.memory_space<vmem>>, vector<1x128xf32>,
    %117 = arith.index_cast %105 : i32 to index
    %c0_111 = arith.constant 0 : index
    %118 = vector.load %arg3[%117, %c0_111] : memref<64x1xf32, #tpu.memory_space<vmem>>, vector<1x1xf32>
    %c5_112 = arith.constant 5 : index
    %c0_113 = arith.constant 0 : index
    %119 = vector.load %arg11[%c5_112, %c0_113] : memref<8x1xf32, #tpu.memory_space<vmem>>, vector<1x1xf32>
    tpu.vector_store %arg11[%c5_112, %c0_113], %118 {strides = array<i32>} : memref<8x1xf32, #tpu.memory_space<vmem>>, vector<1x1xf32>,
    %120 = arith.index_cast %106 : i32 to index
    %c0_114 = arith.constant 0 : index
    %121 = vector.load %arg4[%120, %c0_114] : memref<128x1xf32, #tpu.memory_space<vmem>>, vector<1x1xf32>
    %c5_115 = arith.constant 5 : index
    %c0_116 = arith.constant 0 : index
    %122 = vector.load %arg12[%c5_115, %c0_116] : memref<8x1xf32, #tpu.memory_space<vmem>>, vector<1x1xf32>
    tpu.vector_store %arg12[%c5_115, %c0_116], %121 {strides = array<i32>} : memref<8x1xf32, #tpu.memory_space<vmem>>, vector<1x1xf32>,
    %123 = arith.index_cast %107 : i32 to index
    %c0_117 = arith.constant 0 : index
    %124 = vector.load %arg4[%123, %c0_117] : memref<128x1xf32, #tpu.memory_space<vmem>>, vector<1x1xf32>
    %c5_118 = arith.constant 5 : index
    %c0_119 = arith.constant 0 : index
    %125 = vector.load %arg13[%c5_118, %c0_119] : memref<8x1xf32, #tpu.memory_space<vmem>>, vector<1x1xf32>
    tpu.vector_store %arg13[%c5_118, %c0_119], %124 {strides = array<i32>} : memref<8x1xf32, #tpu.memory_space<vmem>>, vector<1x1xf32>,
    %c6 = arith.constant 6 : index
    %126 = memref.load %arg0[%c6] : memref<8xi32, #tpu.memory_space<smem>>
    %c6_120 = arith.constant 6 : index
    %127 = memref.load %arg1[%c6_120] : memref<8xi32, #tpu.memory_space<smem>>
    %c6_121 = arith.constant 6 : index
    %128 = memref.load %arg2[%c6_121] : memref<8xi32, #tpu.memory_space<smem>>
    %129 = arith.index_cast %126 : i32 to index
    %c0_122 = arith.constant 0 : index
    %130 = vector.load %arg5[%129, %c0_122] : memref<64x128xf32, #tpu.memory_space<vmem>>, vector<1x128xf32>
    %c6_123 = arith.constant 6 : index
    %c0_124 = arith.constant 0 : index
    %131 = vector.load %arg8[%c6_123, %c0_124] : memref<8x128xf32, #tpu.memory_space<vmem>>, vector<1x128xf32>
    tpu.vector_store %arg8[%c6_123, %c0_124], %130 {strides = array<i32>} : memref<8x128xf32, #tpu.memory_space<vmem>>, vector<1x128xf32>,
    %132 = arith.index_cast %127 : i32 to index
    %c0_125 = arith.constant 0 : index
    %133 = vector.load %arg6[%132, %c0_125] : memref<128x128xf32, #tpu.memory_space<vmem>>, vector<1x128xf32>
    %c6_126 = arith.constant 6 : index
    %c0_127 = arith.constant 0 : index
    %134 = vector.load %arg9[%c6_126, %c0_127] : memref<8x128xf32, #tpu.memory_space<vmem>>, vector<1x128xf32>
    tpu.vector_store %arg9[%c6_126, %c0_127], %133 {strides = array<i32>} : memref<8x128xf32, #tpu.memory_space<vmem>>, vector<1x128xf32>,
    %135 = arith.index_cast %128 : i32 to index
    %c0_128 = arith.constant 0 : index
    %136 = vector.load %arg6[%135, %c0_128] : memref<128x128xf32, #tpu.memory_space<vmem>>, vector<1x128xf32>
    %c6_129 = arith.constant 6 : index
    %c0_130 = arith.constant 0 : index
    %137 = vector.load %arg10[%c6_129, %c0_130] : memref<8x128xf32, #tpu.memory_space<vmem>>, vector<1x128xf32>
    tpu.vector_store %arg10[%c6_129, %c0_130], %136 {strides = array<i32>} : memref<8x128xf32, #tpu.memory_space<vmem>>, vector<1x128xf32>,
    %138 = arith.index_cast %126 : i32 to index
    %c0_131 = arith.constant 0 : index
    %139 = vector.load %arg3[%138, %c0_131] : memref<64x1xf32, #tpu.memory_space<vmem>>, vector<1x1xf32>
    %c6_132 = arith.constant 6 : index
    %c0_133 = arith.constant 0 : index
    %140 = vector.load %arg11[%c6_132, %c0_133] : memref<8x1xf32, #tpu.memory_space<vmem>>, vector<1x1xf32>
    tpu.vector_store %arg11[%c6_132, %c0_133], %139 {strides = array<i32>} : memref<8x1xf32, #tpu.memory_space<vmem>>, vector<1x1xf32>,
    %141 = arith.index_cast %127 : i32 to index
    %c0_134 = arith.constant 0 : index
    %142 = vector.load %arg4[%141, %c0_134] : memref<128x1xf32, #tpu.memory_space<vmem>>, vector<1x1xf32>
    %c6_135 = arith.constant 6 : index
    %c0_136 = arith.constant 0 : index
    %143 = vector.load %arg12[%c6_135, %c0_136] : memref<8x1xf32, #tpu.memory_space<vmem>>, vector<1x1xf32>
    tpu.vector_store %arg12[%c6_135, %c0_136], %142 {strides = array<i32>} : memref<8x1xf32, #tpu.memory_space<vmem>>, vector<1x1xf32>,
    %144 = arith.index_cast %128 : i32 to index
    %c0_137 = arith.constant 0 : index
    %145 = vector.load %arg4[%144, %c0_137] : memref<128x1xf32, #tpu.memory_space<vmem>>, vector<1x1xf32>
    %c6_138 = arith.constant 6 : index
    %c0_139 = arith.constant 0 : index
    %146 = vector.load %arg13[%c6_138, %c0_139] : memref<8x1xf32, #tpu.memory_space<vmem>>, vector<1x1xf32>
    tpu.vector_store %arg13[%c6_138, %c0_139], %145 {strides = array<i32>} : memref<8x1xf32, #tpu.memory_space<vmem>>, vector<1x1xf32>,
    %c7 = arith.constant 7 : index
    %147 = memref.load %arg0[%c7] : memref<8xi32, #tpu.memory_space<smem>>
    %c7_140 = arith.constant 7 : index
    %148 = memref.load %arg1[%c7_140] : memref<8xi32, #tpu.memory_space<smem>>
    %c7_141 = arith.constant 7 : index
    %149 = memref.load %arg2[%c7_141] : memref<8xi32, #tpu.memory_space<smem>>
    %150 = arith.index_cast %147 : i32 to index
    %c0_142 = arith.constant 0 : index
    %151 = vector.load %arg5[%150, %c0_142] : memref<64x128xf32, #tpu.memory_space<vmem>>, vector<1x128xf32>
    %c7_143 = arith.constant 7 : index
    %c0_144 = arith.constant 0 : index
    %152 = vector.load %arg8[%c7_143, %c0_144] : memref<8x128xf32, #tpu.memory_space<vmem>>, vector<1x128xf32>
    tpu.vector_store %arg8[%c7_143, %c0_144], %151 {strides = array<i32>} : memref<8x128xf32, #tpu.memory_space<vmem>>, vector<1x128xf32>,
    %153 = arith.index_cast %148 : i32 to index
    %c0_145 = arith.constant 0 : index
    %154 = vector.load %arg6[%153, %c0_145] : memref<128x128xf32, #tpu.memory_space<vmem>>, vector<1x128xf32>
    %c7_146 = arith.constant 7 : index
    %c0_147 = arith.constant 0 : index
    %155 = vector.load %arg9[%c7_146, %c0_147] : memref<8x128xf32, #tpu.memory_space<vmem>>, vector<1x128xf32>
    tpu.vector_store %arg9[%c7_146, %c0_147], %154 {strides = array<i32>} : memref<8x128xf32, #tpu.memory_space<vmem>>, vector<1x128xf32>,
    %156 = arith.index_cast %149 : i32 to index
    %c0_148 = arith.constant 0 : index
    %157 = vector.load %arg6[%156, %c0_148] : memref<128x128xf32, #tpu.memory_space<vmem>>, vector<1x128xf32>
    %c7_149 = arith.constant 7 : index
    %c0_150 = arith.constant 0 : index
    %158 = vector.load %arg10[%c7_149, %c0_150] : memref<8x128xf32, #tpu.memory_space<vmem>>, vector<1x128xf32>
    tpu.vector_store %arg10[%c7_149, %c0_150], %157 {strides = array<i32>} : memref<8x128xf32, #tpu.memory_space<vmem>>, vector<1x128xf32>,
    %159 = arith.index_cast %147 : i32 to index
    %c0_151 = arith.constant 0 : index
    %160 = vector.load %arg3[%159, %c0_151] : memref<64x1xf32, #tpu.memory_space<vmem>>, vector<1x1xf32>
    %c7_152 = arith.constant 7 : index
    %c0_153 = arith.constant 0 : index
    %161 = vector.load %arg11[%c7_152, %c0_153] : memref<8x1xf32, #tpu.memory_space<vmem>>, vector<1x1xf32>
    tpu.vector_store %arg11[%c7_152, %c0_153], %160 {strides = array<i32>} : memref<8x1xf32, #tpu.memory_space<vmem>>, vector<1x1xf32>,
    %162 = arith.index_cast %148 : i32 to index
    %c0_154 = arith.constant 0 : index
    %163 = vector.load %arg4[%162, %c0_154] : memref<128x1xf32, #tpu.memory_space<vmem>>, vector<1x1xf32>
    %c7_155 = arith.constant 7 : index
    %c0_156 = arith.constant 0 : index
    %164 = vector.load %arg12[%c7_155, %c0_156] : memref<8x1xf32, #tpu.memory_space<vmem>>, vector<1x1xf32>
    tpu.vector_store %arg12[%c7_155, %c0_156], %163 {strides = array<i32>} : memref<8x1xf32, #tpu.memory_space<vmem>>, vector<1x1xf32>,
    %165 = arith.index_cast %149 : i32 to index
    %c0_157 = arith.constant 0 : index
    %166 = vector.load %arg4[%165, %c0_157] : memref<128x1xf32, #tpu.memory_space<vmem>>, vector<1x1xf32>
    %c7_158 = arith.constant 7 : index
    %c0_159 = arith.constant 0 : index
    %167 = vector.load %arg13[%c7_158, %c0_159] : memref<8x1xf32, #tpu.memory_space<vmem>>, vector<1x1xf32>
    tpu.vector_store %arg13[%c7_158, %c0_159], %166 {strides = array<i32>} : memref<8x1xf32, #tpu.memory_space<vmem>>, vector<1x1xf32>,
    %c0_160 = arith.constant 0 : index
    %c0_161 = arith.constant 0 : index
    %168 = vector.load %arg8[%c0_160, %c0_161] : memref<8x128xf32, #tpu.memory_space<vmem>>, vector<8x128xf32>
    %c0_162 = arith.constant 0 : index
    %c0_163 = arith.constant 0 : index
    %169 = vector.load %arg9[%c0_162, %c0_163] : memref<8x128xf32, #tpu.memory_space<vmem>>, vector<8x128xf32>
    %c0_164 = arith.constant 0 : index
    %c0_165 = arith.constant 0 : index
    %170 = vector.load %arg10[%c0_164, %c0_165] : memref<8x128xf32, #tpu.memory_space<vmem>>, vector<8x128xf32>
    %c0_166 = arith.constant 0 : index
    %c0_167 = arith.constant 0 : index
    %171 = vector.load %arg11[%c0_166, %c0_167] : memref<8x1xf32, #tpu.memory_space<vmem>>, vector<8x1xf32>
    %c0_168 = arith.constant 0 : index
    %c0_169 = arith.constant 0 : index
    %172 = vector.load %arg12[%c0_168, %c0_169] : memref<8x1xf32, #tpu.memory_space<vmem>>, vector<8x1xf32>
    %c0_170 = arith.constant 0 : index
    %c0_171 = arith.constant 0 : index
    %173 = vector.load %arg13[%c0_170, %c0_171] : memref<8x1xf32, #tpu.memory_space<vmem>>, vector<8x1xf32>
    %174 = arith.mulf %168, %168 : vector<8x128xf32>
    %cst = arith.constant dense<0.000000e+00> : vector<8xf32>
    %175 = vector.multi_reduction <add>, %174, %cst [1] : vector<8x128xf32> to vector<8xf32>
    %176 = vector.shape_cast %175 : vector<8xf32> to vector<8x1xf32>
    %177 = arith.mulf %169, %169 : vector<8x128xf32>
    %cst_172 = arith.constant dense<0.000000e+00> : vector<8xf32>
    %178 = vector.multi_reduction <add>, %177, %cst_172 [1] : vector<8x128xf32> to vector<8xf32>
    %179 = vector.shape_cast %178 : vector<8xf32> to vector<8x1xf32>
    %180 = arith.mulf %170, %170 : vector<8x128xf32>
    %cst_173 = arith.constant dense<0.000000e+00> : vector<8xf32>
    %181 = vector.multi_reduction <add>, %180, %cst_173 [1] : vector<8x128xf32> to vector<8xf32>
    %182 = vector.shape_cast %181 : vector<8xf32> to vector<8x1xf32>
    %183 = arith.mulf %168, %169 : vector<8x128xf32>
    %cst_174 = arith.constant dense<0.000000e+00> : vector<8xf32>
    %184 = vector.multi_reduction <add>, %183, %cst_174 [1] : vector<8x128xf32> to vector<8xf32>
    %185 = vector.shape_cast %184 : vector<8xf32> to vector<8x1xf32>
    %186 = arith.mulf %168, %170 : vector<8x128xf32>
    %cst_175 = arith.constant dense<0.000000e+00> : vector<8xf32>
    %187 = vector.multi_reduction <add>, %186, %cst_175 [1] : vector<8x128xf32> to vector<8xf32>
    %188 = vector.shape_cast %187 : vector<8xf32> to vector<8x1xf32>
    %189 = arith.mulf %171, %172 : vector<8x1xf32>
    %190 = arith.mulf %176, %179 : vector<8x1xf32>
    %191 = math.rsqrt %190 : vector<8x1xf32>
    %192 = arith.mulf %189, %191 : vector<8x1xf32>
    %193 = arith.mulf %192, %185 : vector<8x1xf32>
    %194 = arith.mulf %171, %173 : vector<8x1xf32>
    %195 = arith.mulf %176, %182 : vector<8x1xf32>
    %196 = math.rsqrt %195 : vector<8x1xf32>
    %197 = arith.mulf %194, %196 : vector<8x1xf32>
    %198 = arith.mulf %197, %188 : vector<8x1xf32>
    %199 = tpu.iota {dimensions = array<i32: 1>} : vector<8x128xi32>
    %c0_i32 = arith.constant 0 : i32
    %200 = vector.broadcast %c0_i32 : i32 to vector<8x128xi32>
    %201 = arith.cmpi eq, %199, %200 : vector<8x128xi32>
    %c1_i32 = arith.constant 1 : i32
    %202 = vector.broadcast %c1_i32 : i32 to vector<8x128xi32>
    %203 = arith.cmpi eq, %199, %202 : vector<8x128xi32>
    %cst_176 = arith.constant 0.000000e+00 : f32
    %204 = vector.shape_cast %198 : vector<8x1xf32> to vector<8x1xf32>
    %205 = vector.broadcast %204 : vector<8x1xf32> to vector<8x128xf32>
    %206 = vector.broadcast %cst_176 : f32 to vector<8x128xf32>
    %207 = arith.select %203, %205, %206 : vector<8x128xi1>, vector<8x128xf32>
    %208 = vector.shape_cast %193 : vector<8x1xf32> to vector<8x1xf32>
    %209 = vector.broadcast %208 : vector<8x1xf32> to vector<8x128xf32>
    %210 = arith.select %201, %209, %207 : vector<8x128xi1>, vector<8x128xf32>
    %cst_177 = arith.constant dense<0.000000e+00> : vector<128xf32>
    %211 = vector.multi_reduction <add>, %210, %cst_177 [0] : vector<8x128xf32> to vector<128xf32>
    %212 = vector.shape_cast %211 : vector<128xf32> to vector<1x128xf32>
    %c0_178 = arith.constant 0 : index
    %c0_179 = arith.constant 0 : index
    %213 = vector.load %arg7[%c0_178, %c0_179] : memref<1x128xf32, #tpu.memory_space<vmem>>, vector<1x128xf32>
    tpu.vector_store %arg7[%c0_178, %c0_179], %212 {strides = array<i32>} : memref<1x128xf32, #tpu.memory_space<vmem>>, vector<1x128xf32>,
    return
  }
}

</mosaic_0001>

<bundles_post_ra>
// kernel: tpu_custom_call.1
= control target key start
LH: loop header
LB: loop body
LE: loop exit
PB: predicated region body
PF: predicated region fallthrough
CT: control target
= control target key end

     0   :  { %s793_s0 = inlined_call_operand.vmem [shape: s32[8], index: 0, kind: input, shape index: {}]   ;;  %s794_s1 = inlined_call_operand.hbm [shape: s32[8], index: 1, kind: input, shape index: {}]   ;;  %s795_s2 = inlined_call_operand.hbm [shape: s32[8], index: 2, kind: input, shape index: {}]   ;;  %s796_s3 = inlined_call_operand.vmem [shape: f32[64,1], index: 3, kind: input, shape index: {}]   ;;  %s797_s4 = inlined_call_operand.vmem [shape: f32[128,1], index: 4, kind: input, shape index: {}]   ;;  %s798_s5 = inlined_call_operand.vmem [shape: f32[64,128], index: 5, kind: input, shape index: {}]   ;;  %s799_s6 = inlined_call_operand.vmem [shape: f32[128,128], index: 6, kind: input, shape index: {}]   ;;  %s800_s7 = inlined_call_operand.hbm [shape: f32[1,128], index: 7, kind: output, shape index: {}]  }
   0x1   :  { %811 = sst [smem:[#allocation30_spill]] %s800_s7 }
   0x2   :  { %12 = vsyncpa [#allocation11], 0 }
   0x3   :  { %13 = vsyncpa [#allocation10], 0 }
   0x4   :  { %14 = vsyncpa [#allocation14], 0 }
   0x5   :  { %15 = vsyncpa [#allocation9], 0  ;;  %s21_s26 = sshll.u32 %s793_s0, 4  ;;  %s30_s29 = sshll.u32 %s794_s1, 4  ;;  %s22_s26 = int_to_ptr.vmem [resolvable:$true] %s21_s26  ;;  %s31_s29 = int_to_ptr.hbm [resolvable:$true] %s30_s29 }
   0x6   :  { %s472_s30 = smov [#allocation8]   ;;  %s473_s8 = smov [#allocation12]  }
   0x7   :  { %24 = dma.vmem_to_smem %s22_s26, 16, %s472_s30, [#allocation11]  }
   0x8   :  { %33 = dma.hbm_to_smem %s31_s29, 16, %s473_s8, [#allocation10]  }
   0x9   :  { %s39_s11 = sshll.u32 %s795_s2, 4  ;;  %s474_s12 = smov [#allocation13]   ;;  %s40_s11 = int_to_ptr.hbm [resolvable:$true] %s39_s11 }
   0xa   :  { %42 = dma.hbm_to_smem %s40_s11, 16, %s474_s12, [#allocation14]  }
   0xb   :  { %464 = dma.done.wait [#allocation11], 16  }
   0xc   :  { %465 = vsyncadd [#allocation11], 4294967280 }
   0xd   :  { %466 = dma.done.wait [#allocation10], 16  }
   0xe   :  { %467 = vsyncadd [#allocation10], 4294967280 }
   0xf   :  { %468 = dma.done.wait [#allocation14], 16  }
  0x10   :  { %469 = vsyncadd [#allocation14], 4294967280 }
  0x11   :  { %63 = sfence }
  0x12   :  { %s526_s0 = sld [smem:[#allocation12]]  ;;  %vm78_vm0 = vcmask 0   ;;  %v475_v48 = vmov 0  }
  0x13   :  { %s528_s1 = sld [smem:[#allocation12 + $0x1]]  ;;  %399 = vset.pattern.permute.xlu0 %v475_v48  ;;  %398 = vset.pattern.permute.xlu2 %v475_v48 }
  0x14   :  { %s530_s13 = sld [smem:[#allocation12 + $0x2]] }
  0x15   :  { %s532_s2 = sld [smem:[#allocation12 + $0x3]] }
  0x16   :  { %s534_s14 = sld [smem:[#allocation12 + $0x4]] }
  0x17   :  { %s536_s15 = sld [smem:[#allocation12 + $0x5]] }
  0x18   :  { %s70_s18 = scalar_lea.vmem %s799_s6, %s526_s0  ;;  %s542_s19 = sld [smem:[#allocation12 + $0x6]] }
  0x19   :  { %v71_v0 = vld [vmem:[%s70_s18] sm:$0x1]  ;;  %s92_s22 = scalar_lea.vmem %s799_s6, %s528_s1  ;;  %s548_s23 = sld [smem:[#allocation12 + $0x7]] }
  0x1a   :  { %72 = vst [vmem:[#allocation3] sm:$0x1] %v71_v0  ;;  %v93_v1 = vld [vmem:[%s92_s22] sm:$0x1]  ;;  %s113_s26 = scalar_lea.vmem %s799_s6, %s530_s13  ;;  %s554_s27 = sld [smem:[#allocation8]] }
  0x1b   :  { %94 = vst [vmem:[#allocation3 + $0x1] sm:$0x1] %v93_v1  ;;  %v114_v2 = vld [vmem:[%s113_s26] sm:$0x1]  ;;  %s134_s30 = scalar_lea.vmem %s799_s6, %s532_s2  ;;  %s560_s8 = sld [smem:[#allocation8 + $0x1]] }
  0x1c   :  { %115 = vst [vmem:[#allocation3 + $0x2] sm:$0x1] %v114_v2  ;;  %v135_v3 = vld [vmem:[%s134_s30] sm:$0x1]  ;;  %s155_s11 = scalar_lea.vmem %s799_s6, %s534_s14  ;;  %s566_s12 = sld [smem:[#allocation8 + $0x2]] }
  0x1d   :  { %812 = sst [smem:[#allocation20_spill]] %s536_s15  ;;  %136 = vst [vmem:[#allocation3 + $0x3] sm:$0x1] %v135_v3  ;;  %v156_v4 = vld [vmem:[%s155_s11] sm:$0x1]  ;;  %s176_s18 = scalar_lea.vmem %s799_s6, %s536_s15 }
  0x1e   :  { %813 = sst [smem:[#allocation21_spill]] %s542_s19  ;;  %157 = vst [vmem:[#allocation3 + $0x4] sm:$0x1] %v156_v4  ;;  %v177_v5 = vld [vmem:[%s176_s18] sm:$0x1]  ;;  %s197_s24 = scalar_lea.vmem %s799_s6, %s542_s19 }
  0x1f   :  { %814 = sst [smem:[#allocation22_spill]] %s548_s23  ;;  %178 = vst [vmem:[#allocation3 + $0x5] sm:$0x1] %v177_v5  ;;  %v198_v6 = vld [vmem:[%s197_s24] sm:$0x1]  ;;  %s218_s29 = scalar_lea.vmem %s799_s6, %s548_s23 }
  0x20   :  { %s572_s20 = sld [smem:[#allocation8 + $0x3]]  ;;  %199 = vst [vmem:[#allocation3 + $0x6] sm:$0x1] %v198_v6  ;;  %v219_v7 = vld [vmem:[%s218_s29] sm:$0x1]  ;;  %s67_s11 = scalar_lea.vmem %s798_s5, %s554_s27 }
  0x21   :  { %s578_s25 = sld [smem:[#allocation8 + $0x4]]  ;;  %220 = vst [vmem:[#allocation3 + $0x7] sm:$0x1] %v219_v7  ;;  %v68_v8 = vld [vmem:[%s67_s11] sm:$0x1]  ;;  %s89_s21 = scalar_lea.vmem %s798_s5, %s560_s8 }
  0x22   :  { %s584_s30 = sld [smem:[#allocation8 + $0x5]]  ;;  %69 = vst [vmem:[#allocation2] sm:$0x1] %v68_v8  ;;  %v90_v9 = vld [vmem:[%s89_s21] sm:$0x1]  ;;  %s110_s28 = scalar_lea.vmem %s798_s5, %s566_s12 }
  0x23   :  { %s590_s16 = sld [smem:[#allocation8 + $0x6]]  ;;  %91 = vst [vmem:[#allocation2 + $0x1] sm:$0x1] %v90_v9  ;;  %v111_v10 = vld [vmem:[%s110_s28] sm:$0x1] }
  0x24   :  { %s596_s22 = sld [smem:[#allocation8 + $0x7]]  ;;  %112 = vst [vmem:[#allocation2 + $0x2] sm:$0x1] %v111_v10 }
  0x25   :  { %s602_s29 = sld [smem:[#allocation13]] }
  0x26   :  { %s131_s11 = scalar_lea.vmem %s798_s5, %s572_s20  ;;  %s608_s17 = sld [smem:[#allocation13 + $0x1]] }
  0x27   :  { %v132_v11 = vld [vmem:[%s131_s11] sm:$0x1]  ;;  %s152_s7 = scalar_lea.vmem %s798_s5, %s578_s25  ;;  %s614_s24 = sld [smem:[#allocation13 + $0x2]] }
  0x28   :  { %133 = vst [vmem:[#allocation2 + $0x3] sm:$0x1] %v132_v11  ;;  %v153_v12 = vld [vmem:[%s152_s7] sm:$0x1]  ;;  %s173_s23 = scalar_lea.vmem %s798_s5, %s584_s30  ;;  %s620_s9 = sld [smem:[#allocation13 + $0x3]]  ;;  %v234_v15 = vld [vmem:[#allocation3] sm:$0xff] }
  0x29   :  { %154 = vst [vmem:[#allocation2 + $0x4] sm:$0x1] %v153_v12  ;;  %v174_v13 = vld [vmem:[%s173_s23] sm:$0x1]  ;;  %s194_s19 = scalar_lea.vmem %s798_s5, %s590_s16  ;;  %s626_s18 = sld [smem:[#allocation13 + $0x4]]  ;;  %v242_v17 = vmul.f32 %v234_v15, %v234_v15 }
  0x2a   :  { %815 = sst [smem:[#allocation23_spill]] %s596_s22  ;;  %175 = vst [vmem:[#allocation2 + $0x5] sm:$0x1] %v174_v13  ;;  %v195_v14 = vld [vmem:[%s194_s19] sm:$0x1]  ;;  %s215_s15 = scalar_lea.vmem %s798_s5, %s596_s22 }
  0x2b   :  { %816 = sst [smem:[#allocation24_spill]] %s602_s29  ;;  %196 = vst [vmem:[#allocation2 + $0x6] sm:$0x1] %v195_v14  ;;  %v216_v16 = vld [vmem:[%s215_s15] sm:$0x1]  ;;  %s73_s10 = scalar_lea.vmem %s799_s6, %s602_s29  ;;  %243 = vadd.xlane.f32.xlu1 %v242_v17 }
  0x2c   :  { %817 = sst [smem:[#allocation25_spill]] %s608_s17  ;;  %217 = vst [vmem:[#allocation2 + $0x7] sm:$0x1] %v216_v16  ;;  %v74_v18 = vld [vmem:[%s73_s10] sm:$0x1]  ;;  %s95_s21 = scalar_lea.vmem %s799_s6, %s608_s17 }
  0x2d   :  { %818 = sst [smem:[#allocation26_spill]] %s614_s24  ;;  %75 = vst [vmem:[#allocation4] sm:$0x1] %v74_v18  ;;  %v96_v19 = vld [vmem:[%s95_s21] sm:$0x1]  ;;  %s116_s15 = scalar_lea.vmem %s799_s6, %s614_s24 }
  0x2e   :  { %s632_s26 = sld [smem:[#allocation13 + $0x5]]  ;;  %97 = vst [vmem:[#allocation4 + $0x1] sm:$0x1] %v96_v19  ;;  %v117_v20 = vld [vmem:[%s116_s15] sm:$0x1]  ;;  %s137_s11 = scalar_lea.vmem %s799_s6, %s620_s9 }
  0x2f   :  { %s642_s5 = sld [smem:[#allocation13 + $0x6]]  ;;  %118 = vst [vmem:[#allocation4 + $0x2] sm:$0x1] %v117_v20  ;;  %v138_v21 = vld [vmem:[%s137_s11] sm:$0x1]  ;;  %s158_s21 = scalar_lea.vmem %s799_s6, %s626_s18 }
  0x30   :  { %s648_s23 = sld [smem:[#allocation13 + $0x7]]  ;;  %139 = vst [vmem:[#allocation4 + $0x3] sm:$0x1] %v138_v21  ;;  %v159_v22 = vld [vmem:[%s158_s21] sm:$0x1]  ;;  %s80_s22 = scalar_lea.vmem %s797_s4, %s526_s0 }
  0x31   :  { %160 = vst [vmem:[#allocation4 + $0x4] sm:$0x1] %v159_v22  ;;  %v81_v33 = vld [vmem:[%s80_s22] sm:$0x1]  ;;  %s122_s0 = scalar_lea.vmem %s797_s4, %s530_s13  ;;  %s140_s19 = scalar_lea.vmem %s796_s3, %s572_s20 }
  0x32   :  { %82 = vst.msk [vmem:[#allocation6] sm:$0x1] %vm78_vm0, %v81_v33  ;;  %v123_v37 = vld [vmem:[%s122_s0] sm:$0x1]  ;;  %s823_s21 = sld [smem:[#allocation21_spill]]  ;;  %s161_s22 = scalar_lea.vmem %s796_s3, %s578_s25 }
  0x33   :  { %v233_v24 = vld [vmem:[#allocation2] sm:$0xff]  ;;  %s164_s15 = scalar_lea.vmem %s797_s4, %s534_s14  ;;  %s825_s10 = sld [smem:[#allocation22_spill]]  ;;  %124 = vst.msk [vmem:[#allocation6 + $0x2] sm:$0x1] %vm78_vm0, %v123_v37 }
  0x34   :  { %819 = sst [smem:[#allocation27_spill]] %s632_s26  ;;  %s179_s24 = scalar_lea.vmem %s799_s6, %s632_s26  ;;  %v239_v26 = vmul.f32 %v233_v24, %v233_v24  ;;  %v248_v28 = vmul.f32 %v234_v15, %v233_v24  ;;  %v141_v38 = vld [vmem:[%s140_s19] sm:$0x1] }
  0x35   :  { %820 = sst [smem:[#allocation28_spill]] %s642_s5  ;;  %v180_v23 = vld [vmem:[%s179_s24] sm:$0x1]  ;;  %s200_s28 = scalar_lea.vmem %s799_s6, %s642_s5  ;;  %142 = vst.msk [vmem:[#allocation5 + $0x3] sm:$0x1] %vm78_vm0, %v141_v38 }
  0x36   :  { %821 = sst [smem:[#allocation29_spill]] %s648_s23  ;;  %181 = vst [vmem:[#allocation4 + $0x5] sm:$0x1] %v180_v23  ;;  %v201_v25 = vld [vmem:[%s200_s28] sm:$0x1]  ;;  %s221_s11 = scalar_lea.vmem %s799_s6, %s648_s23  ;;  %240 = vadd.xlane.f32.xlu0 %v239_v26  ;;  %249 = vadd.xlane.f32.xlu2 %v248_v28  ;;  %v282_v23 = vlaneseq }
  0x37   :  { %202 = vst [vmem:[#allocation4 + $0x6] sm:$0x1] %v201_v25  ;;  %v222_v27 = vld [vmem:[%s221_s11] sm:$0x1]  ;;  %s76_s6 = scalar_lea.vmem %s796_s3, %s554_s27  ;;  %s98_s28 = scalar_lea.vmem %s796_s3, %s560_s8 }
  0x38   :  { %223 = vst [vmem:[#allocation4 + $0x7] sm:$0x1] %v222_v27  ;;  %s101_s11 = scalar_lea.vmem %s797_s4, %s528_s1  ;;  %s119_s26 = scalar_lea.vmem %s796_s3, %s566_s12  ;;  %v77_v32 = vld [vmem:[%s76_s6] sm:$0x1] }
  0x39   :  { %79 = vst.msk [vmem:[#allocation5] sm:$0x1] %vm78_vm0, %v77_v32  ;;  %v99_v34 = vld [vmem:[%s98_s28] sm:$0x1]  ;;  %s822_s1 = sld [smem:[#allocation20_spill]]  ;;  %s143_s23 = scalar_lea.vmem %s797_s4, %s532_s2 }
  0x3a   :  { %v102_v35 = vld [vmem:[%s101_s11] sm:$0x1]  ;;  %100 = vst.msk [vmem:[#allocation5 + $0x1] sm:$0x1] %vm78_vm0, %v99_v34  ;;  %s182_s17 = scalar_lea.vmem %s796_s3, %s584_s30  ;;  %s826_s27 = sld [smem:[#allocation24_spill]] }
  0x3b   :  { %v120_v36 = vld [vmem:[%s119_s26] sm:$0x1]  ;;  %103 = vst.msk [vmem:[#allocation6 + $0x1] sm:$0x1] %vm78_vm0, %v102_v35  ;;  %s824_s26 = sld [smem:[#allocation23_spill]]  ;;  %s203_s24 = scalar_lea.vmem %s796_s3, %s590_s16 }
  0x3c   :  { %121 = vst.msk [vmem:[#allocation5 + $0x2] sm:$0x1] %vm78_vm0, %v120_v36  ;;  %v144_v39 = vld [vmem:[%s143_s23] sm:$0x1]  ;;  %s827_s8 = sld [smem:[#allocation25_spill]]  ;;  %s206_s5 = scalar_lea.vmem %s797_s4, %s823_s21 }
  0x3d   :  { %v162_v40 = vld [vmem:[%s161_s22] sm:$0x1]  ;;  %145 = vst.msk [vmem:[#allocation6 + $0x3] sm:$0x1] %vm78_vm0, %v144_v39  ;;  %s828_s12 = sld [smem:[#allocation26_spill]]  ;;  %s227_s22 = scalar_lea.vmem %s797_s4, %s825_s10 }
  0x3e   :  { %v165_v41 = vld [vmem:[%s164_s15] sm:$0x1]  ;;  %163 = vst.msk [vmem:[#allocation5 + $0x4] sm:$0x1] %vm78_vm0, %v162_v40  ;;  %s829_s15 = sld [smem:[#allocation27_spill]]  ;;  %s146_s14 = scalar_lea.vmem %s797_s4, %s620_s9 }
  0x3f   :  { %v235_v29 = vld [vmem:[#allocation4] sm:$0xff]  ;;  %s185_s29 = scalar_lea.vmem %s797_s4, %s822_s1  ;;  %v183_v42 = vld [vmem:[%s182_s17] sm:$0x1]  ;;  %166 = vst.msk [vmem:[#allocation6 + $0x4] sm:$0x1] %vm78_vm0, %v165_v41  ;;  %s830_s17 = sld [smem:[#allocation28_spill]] }
  0x40   :  { %v245_v30 = vmul.f32 %v235_v29, %v235_v29  ;;  %v251_v31 = vmul.f32 %v235_v29, %v233_v24  ;;  %v186_v43 = vld [vmem:[%s185_s29] sm:$0x1]  ;;  %184 = vst.msk [vmem:[#allocation5 + $0x5] sm:$0x1] %vm78_vm0, %v183_v42  ;;  %s83_s7 = scalar_lea.vmem %s797_s4, %s826_s27  ;;  %s831_s11 = sld [smem:[#allocation29_spill]]  ;;  %v283_v24 = vand.u32 127, %v282_v23 }
  0x41   :  { %s224_s13 = scalar_lea.vmem %s796_s3, %s824_s26  ;;  %v204_v44 = vld [vmem:[%s203_s24] sm:$0x1]  ;;  %187 = vst.msk [vmem:[#allocation6 + $0x5] sm:$0x1] %vm78_vm0, %v186_v43  ;;  %s167_s24 = scalar_lea.vmem %s797_s4, %s626_s18 }
  0x42   :  { %246 = vadd.xlane.f32.xlu0 %v245_v30  ;;  %252 = vadd.xlane.f32.xlu1 %v251_v31  ;;  %v207_v45 = vld [vmem:[%s206_s5] sm:$0x1]  ;;  %s104_s2 = scalar_lea.vmem %s797_s4, %s827_s8  ;;  %205 = vst.msk [vmem:[#allocation5 + $0x6] sm:$0x1] %vm78_vm0, %v204_v44  ;;  %vm285_vm7 = vcmp.eq.s32.totalorder %v283_v24, 1  ;;  %vm284_vm8 = vcmp.eq.s32.totalorder %v283_v24, 0 }
  0x43   :  { %v225_v46 = vld [vmem:[%s224_s13] sm:$0x1]  ;;  %s125_s25 = scalar_lea.vmem %s797_s4, %s828_s12  ;;  %208 = vst.msk [vmem:[#allocation6 + $0x6] sm:$0x1] %vm78_vm0, %v207_v45  ;;  %s832_s20 = sld [smem:[#allocation30_spill]] }
  0x44   :  { %v228_v47 = vld [vmem:[%s227_s22] sm:$0x1]  ;;  %226 = vst.msk [vmem:[#allocation5 + $0x7] sm:$0x1] %vm78_vm0, %v225_v46  ;;  %s188_s12 = scalar_lea.vmem %s797_s4, %s829_s15 }
  0x45   :  { %v84_v49 = vld [vmem:[%s83_s7] sm:$0x1]  ;;  %229 = vst.msk [vmem:[#allocation6 + $0x7] sm:$0x1] %vm78_vm0, %v228_v47  ;;  %s209_s1 = scalar_lea.vmem %s797_s4, %s830_s17 }
  0x46   :  { %v105_v50 = vld [vmem:[%s104_s2] sm:$0x1]  ;;  %85 = vst.msk [vmem:[#allocation7] sm:$0x1] %vm78_vm0, %v84_v49  ;;  %s230_s18 = scalar_lea.vmem %s797_s4, %s831_s11  ;;  %s476_s4 = smov [#allocation15]  }
  0x47   :  { %v126_v51 = vld [vmem:[%s125_s25] sm:$0x1]  ;;  %106 = vst.msk [vmem:[#allocation7 + $0x1] sm:$0x1] %vm78_vm0, %v105_v50  ;;  %s310_s16 = sshll.u32 %s476_s4, 4  ;;  %s311_s16 = int_to_ptr.vmem [resolvable:$true] %s310_s16 }
  0x48   :  { %v147_v52 = vld [vmem:[%s146_s14] sm:$0x1]  ;;  %127 = vst.msk [vmem:[#allocation7 + $0x2] sm:$0x1] %vm78_vm0, %v126_v51 }
  0x49   :  { %v168_v53 = vld [vmem:[%s167_s24] sm:$0x1]  ;;  %148 = vst.msk [vmem:[#allocation7 + $0x3] sm:$0x1] %vm78_vm0, %v147_v52  ;;  %s312_s21 = sshll.u32 %s832_s20, 4  ;;  %s313_s21 = int_to_ptr.hbm [resolvable:$true] %s312_s21 }
  0x4a   :  { %v189_v55 = vld [vmem:[%s188_s12] sm:$0x1]  ;;  %169 = vst.msk [vmem:[#allocation7 + $0x4] sm:$0x1] %vm78_vm0, %v168_v53 }
  0x4b   :  { %v210_v56 = vld [vmem:[%s209_s1] sm:$0x1]  ;;  %190 = vst.msk [vmem:[#allocation7 + $0x5] sm:$0x1] %vm78_vm0, %v189_v55  ;;  %v236_v2 = vld [vmem:[#allocation5] sm:$0xff] }
  0x4c   :  { %v231_v58 = vld [vmem:[%s230_s18] sm:$0x1]  ;;  %211 = vst.msk [vmem:[#allocation7 + $0x6] sm:$0x1] %vm78_vm0, %v210_v56 }
  0x4d   :  { %232 = vst.msk [vmem:[#allocation7 + $0x7] sm:$0x1] %vm78_vm0, %v231_v58  ;;  %v237_v3 = vld [vmem:[#allocation6] sm:$0xff] }
  0x4e   :  { %v254_v5 = vmul.f32 %v237_v3, %v236_v2 }
  0x54   :  { %v238_v15 = vld [vmem:[#allocation7] sm:$0xff] }
  0x55   :  { %v268_v17 = vmul.f32 %v238_v15, %v236_v2 }
  0x9e   :  { %v244_v54 = vpop.xlane.xlu1 %243 }
  0xa9   :  { %v241_v57 = vpop.xlane.xlu0 %240  ;;  %v250_v9 = vpop.xlane.xlu2 %249 }
  0xaa   :  { %v255_v59 = vmul.f32 %v244_v54, %v241_v57 }
  0xac   :  { %400 = vrsqrt.f32 %v255_v59  ;;  %vm262_vm2 = vweird.f32 %v255_v59 }
  0xb2   :  { %v401_v60 = vpop.eup %400 }
  0xb3   :  { %v257_v62 = vmul.f32 %v401_v60, %v255_v59  ;;  %vm263_vm1 = vweird.f32 %v401_v60 }
  0xb4   :  { %vm264_vm3 = vmor %vm262_vm2, %vm263_vm1 }
  0xb5   :  { %v247_v61 = vpop.xlane.xlu0 %246  ;;  %v258_v0 = vmul.f32 %v401_v60, %v257_v62  ;;  %v253_v19 = vpop.xlane.xlu1 %252 }
  0xb6   :  { %v269_v63 = vmul.f32 %v247_v61, %v241_v57 }
  0xb7   :  { %v259_v1 = vmul.f32 0.5, %v258_v0 }
  0xb8   :  { %402 = vrsqrt.f32 %v269_v63  ;;  %vm276_vm5 = vweird.f32 %v269_v63 }
  0xb9   :  { %v260_v4 = vsub.f32 1.5, %v259_v1 }
  0xbb   :  { %v261_v7 = vmul.f32 %v401_v60, %v260_v4 }
  0xbd   :  { %v265_v10 = vsel %vm264_vm3, %v401_v60, %v261_v7 }
  0xbe   :  { %v403_v6 = vpop.eup %402  ;;  %v266_v12 = vmul.f32 %v265_v10, %v254_v5 }
  0xbf   :  { %v271_v8 = vmul.f32 %v403_v6, %v269_v63  ;;  %vm277_vm4 = vweird.f32 %v403_v6 }
  0xc0   :  { %v267_v14 = vmul.f32 %v266_v12, %v250_v9  ;;  %vm278_vm6 = vmor %vm276_vm5, %vm277_vm4 }
  0xc1   :  { %v272_v11 = vmul.f32 %v403_v6, %v271_v8 }
  0xc2   :  { %294 = vperm.xlu0 %399, %v267_v14  }
  0xc3   :  { %v273_v13 = vmul.f32 0.5, %v272_v11 }
  0xc5   :  { %v274_v16 = vsub.f32 1.5, %v273_v13 }
  0xc7   :  { %v275_v18 = vmul.f32 %v403_v6, %v274_v16 }
  0xc9   :  { %v279_v20 = vsel %vm278_vm6, %v403_v6, %v275_v18 }
  0xca   :  { %v280_v21 = vmul.f32 %v279_v20, %v268_v17 }
  0xcc   :  { %v281_v22 = vmul.f32 %v280_v21, %v253_v19 }
  0xce   :  { %288 = vperm.xlu2 %398, %v281_v22  }
 0x128   :  { %v289_v25 = vpop.permute.xlu2 %288 }
 0x129   :  { %v291_v26 = vsel %vm285_vm7, %v289_v25, 0.0 }
 0x134   :  { %v295_v27 = vpop.permute.xlu0 %294 }
 0x135   :  { %v297_v28 = vsel %vm284_vm8, %v295_v27, %v291_v26 }
 0x136   :  { %v298_v29 = vrot.slane %v297_v28, 4 }
 0x138   :  { %v299_v30 = vadd.f32 %v298_v29, %v297_v28 }
 0x13a   :  { %v300_v31 = vrot.slane %v299_v30, 2 }
 0x13c   :  { %v301_v32 = vadd.f32 %v300_v31, %v299_v30 }
 0x13e   :  { %v302_v33 = vrot.slane %v301_v32, 1 }
 0x140   :  { %v303_v34 = vadd.f32 %v302_v33, %v301_v32 }
 0x142   :  { %304 = vst [vmem:[#allocation15] sm:$0x1] %v303_v34 }
 0x143   :  { %315 = dma.vmem_to_hbm [thread:$0]  %s311_s16, 16, %s313_s21, [#allocation9]  }
 0x144   :  { %470 = dma.done.wait [#allocation9], 16  }
 0x145   :  { %471 = vsyncadd [#allocation9], 4294967280 }
 0x146   :  { %320 = vsyncpa [#allocation9], 1 }
 0x147   :  { %321 = vsyncpa [#allocation10], 1 }
 0x148   :  { %322 = vsyncpa [#allocation14], 1 }
 0x149   :  { %323 = vsyncpa [#allocation11], 1 }

</bundles_post_ra>
